<compile_context>
chip_gen: v5e
topology: v5e:2x2
jax: 0.10.0
libtpu: 0.0.40
codegen_flags: <defaults>
</compile_context>

<pallas_src>
import functools

import jax
import jax.numpy as jnp
from jax.experimental import pallas as pl
from jax.experimental.pallas import tpu as pltpu

LANES = 128
SUBLANES = 8
MAX_TM = 2048   # rows per grid step


def _round_up(x, m):
    return ((x + m - 1) // m) * m


def _focal_kernel(alpha, gamma, n_elems, tm, grid_m, steps_per_core,
                  flag_ref, yp_ref, yt_ref, out_ref):
    c = pl.program_id(0)              # parallel (megacore) axis
    s = pl.program_id(1)              # sequential reduction axis
    t = c * steps_per_core + s        # unclamped global row-tile index

    @pl.when(s == 0)
    def _():
        out_ref[...] = jnp.zeros_like(out_ref)

    x = yp_ref[...].astype(jnp.float32)
    y = yt_ref[...].astype(jnp.float32)
    one_m_y = 1.0 - y
    alpha_factor = y * alpha + one_m_y * (1.0 - alpha)

    def _focal_pow(base):
        # Avoid jnp.power's exp/log pair for the common cases.
        if gamma == 2.0:
            return base * base
        if float(gamma).is_integer() and gamma >= 0:
            return jax.lax.integer_pow(base, int(gamma))
        return jnp.power(base, gamma)

    def _accumulate(loss):
        # Interior tiles are fully valid: no mask work at all.
        @pl.when(t < grid_m - 1)
        def _():
            part = loss.reshape(tm // SUBLANES, SUBLANES, LANES).sum(axis=0)
            out_ref[...] += part.reshape(1, SUBLANES, LANES)

        # Boundary tile (and fully out-of-range overflow tiles that re-read the
        # clamped last block under the megacore split): zero invalid lanes with
        # a select -- never a multiply -- so garbage/NaN in the uninitialized
        # VMEM tail of a partial block cannot leak into the sum.
        @pl.when(t >= grid_m - 1)
        def _():
            row = jax.lax.broadcasted_iota(jnp.int32, (tm, LANES), 0)
            lane = jax.lax.broadcasted_iota(jnp.int32, (tm, LANES), 1)
            grow = t * tm + row                 # global row id: no int32 overflow
            full_rows = n_elems // LANES        # even for multi-billion-element inputs
            tail = n_elems % LANES
            mask = grow < full_rows
            if tail:
                mask = mask | ((grow == full_rows) & (lane < tail))
            safe = jnp.where(mask, loss, 0.0)
            part = safe.reshape(tm // SUBLANES, SUBLANES, LANES).sum(axis=0)
            out_ref[...] += part.reshape(1, SUBLANES, LANES)

    use_logits = flag_ref[0] != 0

    # ---- branch A: y_pred are raw logits (max > 1 or min < 0) --------------
    @pl.when(use_logits)
    def _():
        e = jnp.exp(-jnp.abs(x))                      # shared: log1p term + sigmoid
        s_abs = pl.reciprocal(1.0 + e, approx=True)   # sigmoid(|x|)
        sig = jnp.where(x >= 0.0, s_abs, 1.0 - s_abs)
        # numerically stable BCE-with-logits (== F.binary_cross_entropy_with_logits)
        bce = jnp.maximum(x, 0.0) - x * y + jnp.log1p(e)
        pt = y * sig + one_m_y * (1.0 - sig)
        _accumulate(alpha_factor * _focal_pow(1.0 - pt) * bce)

    # ---- branch B: y_pred are probabilities in [0, 1] -----------------------
    @pl.when(jnp.logical_not(use_logits))
    def _():
        eps = 1e-7
        p = jnp.clip(x, eps, 1.0 - eps)
        bce = -y * jnp.log(p) - one_m_y * jnp.log(1.0 - p)
        pt = y * p + one_m_y * (1.0 - p)
        _accumulate(alpha_factor * _focal_pow(1.0 - pt) * bce)


def soft_focal_loss(y_pred, y_true, alpha=0.25, gamma=2.0,
                    max_tm=MAX_TM, num_cores=2):
    assert y_pred.shape == y_true.shape
    n_elems = y_pred.size

    # Branch decision hoisted out of the per-element loop: one cheap XLA reduce
    # over y_pred, passed to the kernel as a scalar-prefetch flag (exactly
    # mirrors `if torch.max(y_pred) > 1 or torch.min(y_pred) < 0`).
    use_logits = (jnp.max(y_pred) > 1.0) | (jnp.min(y_pred) < 0.0)
    flag = use_logits.astype(jnp.int32).reshape(1)

    yp = y_pred.reshape(-1)
    yt = y_true.reshape(-1)
    pad = (-n_elems) % LANES
    if pad:   # only ragged sizes pay a (minimal) pad copy; padded lanes are masked
        yp = jnp.pad(yp, (0, pad))
        yt = jnp.pad(yt, (0, pad))
    rows = (n_elems + pad) // LANES
    yp = yp.reshape(rows, LANES)
    yt = yt.reshape(rows, LANES)

    tm = min(int(max_tm), _round_up(rows, SUBLANES))    # rows per tile, mult. of 8
    grid_m = pl.cdiv(rows, tm)                          # partial final tile allowed
    nc = num_cores if grid_m >= num_cores else 1
    spc = pl.cdiv(grid_m, nc)                           # row-tiles per core

    kernel = functools.partial(_focal_kernel, float(alpha), float(gamma),
                               int(n_elems), int(tm), int(grid_m), int(spc))

    def in_map(c, s, flag_ref):
        # Clamp overflow tiles of the last core onto the last real tile; the
        # kernel fully masks their contribution.
        return (jnp.minimum(c * spc + s, grid_m - 1), 0)

    partials = pl.pallas_call(
        kernel,
        out_shape=jax.ShapeDtypeStruct((nc, SUBLANES, LANES), jnp.float32),
        grid_spec=pltpu.PrefetchScalarGridSpec(
            num_scalar_prefetch=1,
            grid=(nc, spc),
            in_specs=[
                pl.BlockSpec((tm, LANES), in_map),   # y_pred (native dtype)
                pl.BlockSpec((tm, LANES), in_map),   # y_true (native dtype)
            ],
            out_specs=pl.BlockSpec((1, SUBLANES, LANES),
                                   lambda c, s, flag_ref: (c, 0, 0)),
        ),
        compiler_params=pltpu.CompilerParams(
            dimension_semantics=("parallel", "arbitrary")),
    )(flag, yp, yt)

    # Final cross-lane reduction + mean (tiny: nc*8*128 elements).
    return jnp.sum(partials) / n_elems


def _reference(y_pred, y_true, alpha=0.25, gamma=2.0):
    y_pred = y_pred.astype(jnp.float32)
    y_true = y_true.astype(jnp.float32)
    use_logits = (jnp.max(y_pred) > 1.0) | (jnp.min(y_pred) < 0.0)

    sig = jax.nn.sigmoid(y_pred)
    bce_l = (jnp.maximum(y_pred, 0.0) - y_pred * y_true
             + jnp.log1p(jnp.exp(-jnp.abs(y_pred))))
    pt_l = y_true * sig + (1 - y_true) * (1 - sig)

    eps = 1e-7
    p = jnp.clip(y_pred, eps, 1.0 - eps)
    bce_p = -y_true * jnp.log(p) - (1 - y_true) * jnp.log(1 - p)
    pt_p = y_true * p + (1 - y_true) * (1 - p)

    bce = jnp.where(use_logits, bce_l, bce_p)
    pt = jnp.where(use_logits, pt_l, pt_p)
    af = y_true * alpha + (1 - y_true) * (1 - alpha)
    fw = jnp.power(1.0 - pt, gamma)
    return jnp.mean(af * fw * bce)


if __name__ == "__main__":
    key = jax.random.PRNGKey(0)
    k1, k2, k3, k4 = jax.random.split(key, 4)

    # Probability maps + soft labels, small NCHW (lane-aligned -> zero-copy path).
    y_pred = jax.random.uniform(k1, (2, 4, 16, 16), jnp.float32, 0.0, 1.0)
    y_true = jax.random.uniform(k2, (2, 4, 16, 16), jnp.float32, 0.0, 1.0)

    loss = soft_focal_loss(y_pred, y_true)
    jax.block_until_ready(loss)
    ref = _reference(y_pred, y_true)
    assert jnp.allclose(loss, ref, rtol=1e-5, atol=1e-6), (loss, ref)

    # Logits branch.  The in-kernel sigmoid uses the approximate EUP reciprocal
    # (~2^-12 relative error per element), so this check is correspondingly
    # looser; the probability-branch checks pin exact plumbing at 1e-5.
    y_logits = jax.random.normal(k1, (2, 4, 16, 16), jnp.float32) * 3.0
    loss2 = soft_focal_loss(y_logits, y_true)
    jax.block_until_ready(loss2)
    ref2 = _reference(y_logits, y_true)
    assert jnp.allclose(loss2, ref2, rtol=1e-2, atol=1e-5), (loss2, ref2)

    # Multi-tile grid: megacore split (grid (2,1)) and single-core accumulator
    # path (grid (1,2)).
    loss3 = soft_focal_loss(y_pred, y_true, max_tm=8)
    jax.block_until_ready(loss3)
    assert jnp.allclose(loss3, ref, rtol=1e-5, atol=1e-6), (loss3, ref)

    loss3b = soft_focal_loss(y_pred, y_true, max_tm=8, num_cores=1)
    jax.block_until_ready(loss3b)
    assert jnp.allclose(loss3b, ref, rtol=1e-5, atol=1e-6), (loss3b, ref)

    # Odd tile count (grid_m=3 on 2 cores) exercises the clamped, fully-masked
    # overflow tile on the second core.
    y_pred_o = jax.random.uniform(k3, (3, 4, 16, 16), jnp.float32, 0.0, 1.0)
    y_true_o = jax.random.uniform(k4, (3, 4, 16, 16), jnp.float32, 0.0, 1.0)
    loss4 = soft_focal_loss(y_pred_o, y_true_o, max_tm=8)
    jax.block_until_ready(loss4)
    ref4 = _reference(y_pred_o, y_true_o)
    assert jnp.allclose(loss4, ref4, rtol=1e-5, atol=1e-6), (loss4, ref4)

    # Ragged size exercises the minimal lane pad + in-kernel tail mask.
    y_pred_r = jax.random.uniform(k3, (2, 3, 13, 17), jnp.float32, 0.0, 1.0)
    y_true_r = jax.random.uniform(k4, (2, 3, 13, 17), jnp.float32, 0.0, 1.0)
    loss5 = soft_focal_loss(y_pred_r, y_true_r)
    jax.block_until_ready(loss5)
    ref5 = _reference(y_pred_r, y_true_r)
    assert jnp.allclose(loss5, ref5, rtol=1e-5, atol=1e-6), (loss5, ref5)

    # bf16 inputs stream natively (half the HBM bytes) and upcast in-kernel.
    y_pred_b = y_pred.astype(jnp.bfloat16)
    y_true_b = y_true.astype(jnp.bfloat16)
    loss6 = soft_focal_loss(y_pred_b, y_true_b)
    jax.block_until_ready(loss6)
    ref6 = _reference(y_pred_b, y_true_b)
    assert jnp.allclose(loss6, ref6, rtol=1e-5, atol=1e-6), (loss6, ref6)

    print("KERNEL_OK")
</pallas_src>

<mosaic_0001>
module attributes {stable_mosaic.version = 11 : i64} {
  func.func @_focal_kernel(%arg0: i32, %arg1: i32, %arg2: memref<1xi32, #tpu.memory_space<smem>>, %arg3: memref<16x128xf32, #tpu.memory_space<vmem>>, %arg4: memref<16x128xf32, #tpu.memory_space<vmem>>, %arg5: memref<1x8x128xf32, #tpu.memory_space<vmem>>) attributes {dimension_semantics = [#tpu.dimension_semantics<parallel>, #tpu.dimension_semantics<arbitrary>], iteration_bounds = array<i64: 1, 1>, scalar_prefetch = 1 : i64, scratch_operands = 0 : i64, tpu.core_type = #tpu.core_type<tc>, window_params = [{transform_indices = @transform_0, window_bounds = array<i64: 16, 128>}, {transform_indices = @transform_1, window_bounds = array<i64: 16, 128>}, {transform_indices = @transform_2, window_bounds = array<i64: 1, 8, 128>}]} {
    %c1_i32 = arith.constant 1 : i32
    %0 = arith.muli %arg0, %c1_i32 : i32
    %1 = arith.addi %0, %arg1 : i32
    %c0_i32 = arith.constant 0 : i32
    %2 = arith.cmpi eq, %arg1, %c0_i32 : i32
    %3 = arith.extui %2 : i1 to i32
    %c0_i32_0 = arith.constant 0 : i32
    %4 = arith.cmpi ne, %3, %c0_i32_0 : i32
    scf.if %4 {
      %cst_10 = arith.constant 0.000000e+00 : f32
      %21 = vector.broadcast %cst_10 : f32 to vector<1x8x128xf32>
      %c0_11 = arith.constant 0 : index
      %c0_12 = arith.constant 0 : index
      %c0_13 = arith.constant 0 : index
      %22 = vector.load %arg5[%c0_11, %c0_12, %c0_13] : memref<1x8x128xf32, #tpu.memory_space<vmem>>, vector<1x8x128xf32>
      tpu.vector_store %arg5[%c0_11, %c0_12, %c0_13], %21 {strides = array<i32>} : memref<1x8x128xf32, #tpu.memory_space<vmem>>, vector<1x8x128xf32>,
    } else {
    }
    %c0 = arith.constant 0 : index
    %c0_1 = arith.constant 0 : index
    %5 = vector.load %arg3[%c0, %c0_1] : memref<16x128xf32, #tpu.memory_space<vmem>>, vector<16x128xf32>
    %c0_2 = arith.constant 0 : index
    %c0_3 = arith.constant 0 : index
    %6 = vector.load %arg4[%c0_2, %c0_3] : memref<16x128xf32, #tpu.memory_space<vmem>>, vector<16x128xf32>
    %cst = arith.constant 1.000000e+00 : f32
    %7 = vector.broadcast %cst : f32 to vector<16x128xf32>
    %8 = arith.subf %7, %6 : vector<16x128xf32>
    %cst_4 = arith.constant 2.500000e-01 : f32
    %9 = vector.broadcast %cst_4 : f32 to vector<16x128xf32>
    %10 = arith.mulf %6, %9 : vector<16x128xf32>
    %cst_5 = arith.constant 7.500000e-01 : f32
    %11 = vector.broadcast %cst_5 : f32 to vector<16x128xf32>
    %12 = arith.mulf %8, %11 : vector<16x128xf32>
    %13 = arith.addf %10, %12 : vector<16x128xf32>
    %c0_6 = arith.constant 0 : index
    %14 = memref.load %arg2[%c0_6] : memref<1xi32, #tpu.memory_space<smem>>
    %c0_i32_7 = arith.constant 0 : i32
    %15 = arith.cmpi ne, %14, %c0_i32_7 : i32
    %16 = arith.extui %15 : i1 to i32
    %c0_i32_8 = arith.constant 0 : i32
    %17 = arith.cmpi ne, %16, %c0_i32_8 : i32
    scf.if %17 {
      %21 = math.absf %5 : vector<16x128xf32>
      %cst_10 = arith.constant 0.000000e+00 : f32
      %22 = vector.broadcast %cst_10 : f32 to vector<16x128xf32>
      %23 = arith.subf %22, %21 : vector<16x128xf32>
      %24 = math.exp %23 : vector<16x128xf32>
      %cst_11 = arith.constant 1.000000e+00 : f32
      %25 = vector.broadcast %cst_11 : f32 to vector<16x128xf32>
      %26 = arith.addf %25, %24 : vector<16x128xf32>
      %27 = tpu.reciprocal %26 {approx = true} : vector<16x128xf32> -> vector<16x128xf32>
      %cst_12 = arith.constant 0.000000e+00 : f32
      %28 = vector.broadcast %cst_12 : f32 to vector<16x128xf32>
      %29 = arith.cmpf oge, %5, %28 : vector<16x128xf32>
      %cst_13 = arith.constant 1.000000e+00 : f32
      %30 = vector.broadcast %cst_13 : f32 to vector<16x128xf32>
      %31 = arith.subf %30, %27 : vector<16x128xf32>
      %32 = arith.select %29, %27, %31 : vector<16x128xi1>, vector<16x128xf32>
      %cst_14 = arith.constant 0.000000e+00 : f32
      %33 = vector.broadcast %cst_14 : f32 to vector<16x128xf32>
      %34 = arith.maximumf %5, %33 : vector<16x128xf32>
      %35 = arith.mulf %5, %6 : vector<16x128xf32>
      %36 = arith.subf %34, %35 : vector<16x128xf32>
      %37 = math.log1p %24 : vector<16x128xf32>
      %38 = arith.addf %36, %37 : vector<16x128xf32>
      %39 = arith.mulf %6, %32 : vector<16x128xf32>
      %cst_15 = arith.constant 1.000000e+00 : f32
      %40 = vector.broadcast %cst_15 : f32 to vector<16x128xf32>
      %41 = arith.subf %40, %32 : vector<16x128xf32>
      %42 = arith.mulf %8, %41 : vector<16x128xf32>
      %43 = arith.addf %39, %42 : vector<16x128xf32>
      %cst_16 = arith.constant 1.000000e+00 : f32
      %44 = vector.broadcast %cst_16 : f32 to vector<16x128xf32>
      %45 = arith.subf %44, %43 : vector<16x128xf32>
      %46 = arith.mulf %45, %45 : vector<16x128xf32>
      %47 = arith.mulf %13, %46 : vector<16x128xf32>
      %48 = arith.mulf %47, %38 : vector<16x128xf32>
      %c0_i32_17 = arith.constant 0 : i32
      %49 = arith.cmpi slt, %1, %c0_i32_17 : i32
      %50 = arith.extui %49 : i1 to i32
      %c0_i32_18 = arith.constant 0 : i32
      %51 = arith.cmpi ne, %50, %c0_i32_18 : i32
      scf.if %51 {
        %55 = vector.shape_cast %48 : vector<16x128xf32> to vector<2x8x128xf32>
        %cst_21 = arith.constant dense<0.000000e+00> : vector<8x128xf32>
        %56 = vector.multi_reduction <add>, %55, %cst_21 [0] : vector<2x8x128xf32> to vector<8x128xf32>
        %c0_22 = arith.constant 0 : index
        %c0_23 = arith.constant 0 : index
        %c0_24 = arith.constant 0 : index
        %57 = vector.load %arg5[%c0_22, %c0_23, %c0_24] : memref<1x8x128xf32, #tpu.memory_space<vmem>>, vector<1x8x128xf32>
        %58 = vector.shape_cast %56 : vector<8x128xf32> to vector<1x8x128xf32>
        %59 = arith.addf %57, %58 : vector<1x8x128xf32>
        %c0_25 = arith.constant 0 : index
        %c0_26 = arith.constant 0 : index
        %c0_27 = arith.constant 0 : index
        %60 = vector.load %arg5[%c0_25, %c0_26, %c0_27] : memref<1x8x128xf32, #tpu.memory_space<vmem>>, vector<1x8x128xf32>
        tpu.vector_store %arg5[%c0_25, %c0_26, %c0_27], %59 {strides = array<i32>} : memref<1x8x128xf32, #tpu.memory_space<vmem>>, vector<1x8x128xf32>,
      } else {
      }
      %c0_i32_19 = arith.constant 0 : i32
      %52 = arith.cmpi sge, %1, %c0_i32_19 : i32
      %53 = arith.extui %52 : i1 to i32
      %c0_i32_20 = arith.constant 0 : i32
      %54 = arith.cmpi ne, %53, %c0_i32_20 : i32
      scf.if %54 {
        %55 = tpu.iota {dimensions = array<i32: 0>} : vector<16x128xi32>
        %c16_i32 = arith.constant 16 : i32
        %56 = arith.muli %1, %c16_i32 : i32
        %57 = vector.broadcast %56 : i32 to vector<16x128xi32>
        %58 = arith.addi %57, %55 : vector<16x128xi32>
        %c16_i32_21 = arith.constant 16 : i32
        %59 = vector.broadcast %c16_i32_21 : i32 to vector<16x128xi32>
        %60 = arith.cmpi slt, %58, %59 : vector<16x128xi32>
        %cst_22 = arith.constant 0.000000e+00 : f32
        %61 = vector.broadcast %cst_22 : f32 to vector<16x128xf32>
        %62 = arith.select %60, %48, %61 : vector<16x128xi1>, vector<16x128xf32>
        %63 = vector.shape_cast %62 : vector<16x128xf32> to vector<2x8x128xf32>
        %cst_23 = arith.constant dense<0.000000e+00> : vector<8x128xf32>
        %64 = vector.multi_reduction <add>, %63, %cst_23 [0] : vector<2x8x128xf32> to vector<8x128xf32>
        %c0_24 = arith.constant 0 : index
        %c0_25 = arith.constant 0 : index
        %c0_26 = arith.constant 0 : index
        %65 = vector.load %arg5[%c0_24, %c0_25, %c0_26] : memref<1x8x128xf32, #tpu.memory_space<vmem>>, vector<1x8x128xf32>
        %66 = vector.shape_cast %64 : vector<8x128xf32> to vector<1x8x128xf32>
        %67 = arith.addf %65, %66 : vector<1x8x128xf32>
        %c0_27 = arith.constant 0 : index
        %c0_28 = arith.constant 0 : index
        %c0_29 = arith.constant 0 : index
        %68 = vector.load %arg5[%c0_27, %c0_28, %c0_29] : memref<1x8x128xf32, #tpu.memory_space<vmem>>, vector<1x8x128xf32>
        tpu.vector_store %arg5[%c0_27, %c0_28, %c0_29], %67 {strides = array<i32>} : memref<1x8x128xf32, #tpu.memory_space<vmem>>, vector<1x8x128xf32>,
      } else {
      }
    } else {
    }
    %true = arith.constant true
    %18 = arith.xori %15, %true : i1
    %19 = arith.extui %18 : i1 to i32
    %c0_i32_9 = arith.constant 0 : i32
    %20 = arith.cmpi ne, %19, %c0_i32_9 : i32
    scf.if %20 {
      %cst_10 = arith.constant 1.000000e-07 : f32
      %cst_11 = arith.constant 0.99999988 : f32
      %21 = vector.broadcast %cst_10 : f32 to vector<16x128xf32>
      %22 = arith.maximumf %21, %5 : vector<16x128xf32>
      %23 = vector.broadcast %cst_11 : f32 to vector<16x128xf32>
      %24 = arith.minimumf %23, %22 : vector<16x128xf32>
      %cst_12 = arith.constant 0.000000e+00 : f32
      %25 = vector.broadcast %cst_12 : f32 to vector<16x128xf32>
      %26 = arith.subf %25, %6 : vector<16x128xf32>
      %27 = math.log %24 : vector<16x128xf32>
      %28 = arith.mulf %26, %27 : vector<16x128xf32>
      %cst_13 = arith.constant 1.000000e+00 : f32
      %29 = vector.broadcast %cst_13 : f32 to vector<16x128xf32>
      %30 = arith.subf %29, %24 : vector<16x128xf32>
      %31 = math.log %30 : vector<16x128xf32>
      %32 = arith.mulf %8, %31 : vector<16x128xf32>
      %33 = arith.subf %28, %32 : vector<16x128xf32>
      %34 = arith.mulf %6, %24 : vector<16x128xf32>
      %cst_14 = arith.constant 1.000000e+00 : f32
      %35 = vector.broadcast %cst_14 : f32 to vector<16x128xf32>
      %36 = arith.subf %35, %24 : vector<16x128xf32>
      %37 = arith.mulf %8, %36 : vector<16x128xf32>
      %38 = arith.addf %34, %37 : vector<16x128xf32>
      %cst_15 = arith.constant 1.000000e+00 : f32
      %39 = vector.broadcast %cst_15 : f32 to vector<16x128xf32>
      %40 = arith.subf %39, %38 : vector<16x128xf32>
      %41 = arith.mulf %40, %40 : vector<16x128xf32>
      %42 = arith.mulf %13, %41 : vector<16x128xf32>
      %43 = arith.mulf %42, %33 : vector<16x128xf32>
      %c0_i32_16 = arith.constant 0 : i32
      %44 = arith.cmpi slt, %1, %c0_i32_16 : i32
      %45 = arith.extui %44 : i1 to i32
      %c0_i32_17 = arith.constant 0 : i32
      %46 = arith.cmpi ne, %45, %c0_i32_17 : i32
      scf.if %46 {
        %50 = vector.shape_cast %43 : vector<16x128xf32> to vector<2x8x128xf32>
        %cst_20 = arith.constant dense<0.000000e+00> : vector<8x128xf32>
        %51 = vector.multi_reduction <add>, %50, %cst_20 [0] : vector<2x8x128xf32> to vector<8x128xf32>
        %c0_21 = arith.constant 0 : index
        %c0_22 = arith.constant 0 : index
        %c0_23 = arith.constant 0 : index
        %52 = vector.load %arg5[%c0_21, %c0_22, %c0_23] : memref<1x8x128xf32, #tpu.memory_space<vmem>>, vector<1x8x128xf32>
        %53 = vector.shape_cast %51 : vector<8x128xf32> to vector<1x8x128xf32>
        %54 = arith.addf %52, %53 : vector<1x8x128xf32>
        %c0_24 = arith.constant 0 : index
        %c0_25 = arith.constant 0 : index
        %c0_26 = arith.constant 0 : index
        %55 = vector.load %arg5[%c0_24, %c0_25, %c0_26] : memref<1x8x128xf32, #tpu.memory_space<vmem>>, vector<1x8x128xf32>
        tpu.vector_store %arg5[%c0_24, %c0_25, %c0_26], %54 {strides = array<i32>} : memref<1x8x128xf32, #tpu.memory_space<vmem>>, vector<1x8x128xf32>,
      } else {
      }
      %c0_i32_18 = arith.constant 0 : i32
      %47 = arith.cmpi sge, %1, %c0_i32_18 : i32
      %48 = arith.extui %47 : i1 to i32
      %c0_i32_19 = arith.constant 0 : i32
      %49 = arith.cmpi ne, %48, %c0_i32_19 : i32
      scf.if %49 {
        %50 = tpu.iota {dimensions = array<i32: 0>} : vector<16x128xi32>
        %c16_i32 = arith.constant 16 : i32
        %51 = arith.muli %1, %c16_i32 : i32
        %52 = vector.broadcast %51 : i32 to vector<16x128xi32>
        %53 = arith.addi %52, %50 : vector<16x128xi32>
        %c16_i32_20 = arith.constant 16 : i32
        %54 = vector.broadcast %c16_i32_20 : i32 to vector<16x128xi32>
        %55 = arith.cmpi slt, %53, %54 : vector<16x128xi32>
        %cst_21 = arith.constant 0.000000e+00 : f32
        %56 = vector.broadcast %cst_21 : f32 to vector<16x128xf32>
        %57 = arith.select %55, %43, %56 : vector<16x128xi1>, vector<16x128xf32>
        %58 = vector.shape_cast %57 : vector<16x128xf32> to vector<2x8x128xf32>
        %cst_22 = arith.constant dense<0.000000e+00> : vector<8x128xf32>
        %59 = vector.multi_reduction <add>, %58, %cst_22 [0] : vector<2x8x128xf32> to vector<8x128xf32>
        %c0_23 = arith.constant 0 : index
        %c0_24 = arith.constant 0 : index
        %c0_25 = arith.constant 0 : index
        %60 = vector.load %arg5[%c0_23, %c0_24, %c0_25] : memref<1x8x128xf32, #tpu.memory_space<vmem>>, vector<1x8x128xf32>
        %61 = vector.shape_cast %59 : vector<8x128xf32> to vector<1x8x128xf32>
        %62 = arith.addf %60, %61 : vector<1x8x128xf32>
        %c0_26 = arith.constant 0 : index
        %c0_27 = arith.constant 0 : index
        %c0_28 = arith.constant 0 : index
        %63 = vector.load %arg5[%c0_26, %c0_27, %c0_28] : memref<1x8x128xf32, #tpu.memory_space<vmem>>, vector<1x8x128xf32>
        tpu.vector_store %arg5[%c0_26, %c0_27, %c0_28], %62 {strides = array<i32>} : memref<1x8x128xf32, #tpu.memory_space<vmem>>, vector<1x8x128xf32>,
      } else {
      }
    } else {
    }
    return
  }
  func.func @transform_0(%arg0: i32, %arg1: i32, %arg2: memref<1xi32, #tpu.memory_space<smem>>) -> (i32, i32) {
    %c1_i32 = arith.constant 1 : i32
    %0 = arith.muli %arg0, %c1_i32 : i32
    %1 = arith.addi %0, %arg1 : i32
    %c0_i32 = arith.constant 0 : i32
    %2 = arith.minsi %1, %c0_i32 : i32
    %c0_i32_0 = arith.constant 0 : i32
    %c0_i32_1 = arith.constant 0 : i32
    return %2, %c0_i32_0 : i32, i32
  }
  func.func @transform_1(%arg0: i32, %arg1: i32, %arg2: memref<1xi32, #tpu.memory_space<smem>>) -> (i32, i32) {
    %c1_i32 = arith.constant 1 : i32
    %0 = arith.muli %arg0, %c1_i32 : i32
    %1 = arith.addi %0, %arg1 : i32
    %c0_i32 = arith.constant 0 : i32
    %2 = arith.minsi %1, %c0_i32 : i32
    %c0_i32_0 = arith.constant 0 : i32
    %c0_i32_1 = arith.constant 0 : i32
    return %2, %c0_i32_0 : i32, i32
  }
  func.func @transform_2(%arg0: i32, %arg1: i32, %arg2: memref<1xi32, #tpu.memory_space<smem>>) -> (i32, i32, i32) {
    %c0_i32 = arith.constant 0 : i32
    %c0_i32_0 = arith.constant 0 : i32
    %c0_i32_1 = arith.constant 0 : i32
    return %arg0, %c0_i32, %c0_i32_0 : i32, i32, i32
  }
}

</mosaic_0001>

<bundles_post_ra>
// kernel: tpu_custom_call.1
= control target key start
LH: loop header
LB: loop body
LE: loop exit
PB: predicated region body
PF: predicated region fallthrough
CT: control target
= control target key end

     0   :  { %9 = vsyncpa [#allocation5], 0  ;;  %s462_s0 = inlined_call_operand.<no memory space> [shape: s32[1], index: 0, kind: input, shape index: {}]   ;;  %s463_s1 = inlined_call_operand.hbm [shape: f32[16,128], index: 1, kind: input, shape index: {}]   ;;  %s464_s2 = inlined_call_operand.hbm [shape: f32[16,128], index: 2, kind: input, shape index: {}]   ;;  %s465_s3 = inlined_call_operand.hbm [shape: f32[1,8,128], index: 3, kind: output, shape index: {}]  }
   0x1   :  { %10 = vsyncpa [#allocation8], 0 }
   0x2   :  { %11 = vsyncpa [#allocation6], 0  ;;  %s22_s14 = sshll.u32 %s463_s1, 4  ;;  %s371_s15 = smov [#allocation4]   ;;  %s23_s14 = int_to_ptr.hbm [resolvable:$true] %s22_s14 }
   0x3   :  { %s24_s16 = sshll.u32 %s371_s15, 4  ;;  %s41_s19 = sshll.u32 %s464_s2, 4  ;;  %s25_s16 = int_to_ptr.vmem [resolvable:$true] %s24_s16  ;;  %s42_s19 = int_to_ptr.hbm [resolvable:$true] %s41_s19 }
   0x4   :  { %s372_s20 = smov 128   ;;  %s373_s21 = smov 8  }
   0x5   :  { %30 = dma.hbm_to_vmem [thread:$0]  %s23_s14, 256, %s25_s16, [#allocation5], %s372_s20, %s372_s20, %s373_s21  }
   0x6   :  { %s374_s22 = smov [#allocation7]  }
   0x7   :  { %s43_s23 = sshll.u32 %s374_s22, 4  ;;  %s44_s23 = int_to_ptr.vmem [resolvable:$true] %s43_s23 }
   0x8   :  { %49 = dma.hbm_to_vmem [thread:$0]  %s42_s19, 256, %s44_s23, [#allocation8], %s372_s20, %s372_s20, %s373_s21  }
   0x9   :  { %365 = dma.done.wait [#allocation5], 256  }
   0xa   :  { %366 = vsyncadd [#allocation5], 4294967040 }
   0xb   :  { %367 = dma.done.wait [#allocation8], 256  }
   0xc   :  { %368 = vsyncadd [#allocation8], 4294967040  ;;  %v375_v0 = vmov 0.0   ;;  %v403_v1 = vld [vmem:[#allocation4] sm:$0xff]  ;;  %v405_v2 = vld [vmem:[#allocation4 + $0x8] sm:$0xff]  ;;  %p265_p0 = scmp.eq.s32.totalorder %s462_s0, 0 }
   0xd   :  { %71 = vst [vmem:[#allocation9] sm:$0xff] %v375_v0  ;;  %v407_v3 = vld [vmem:[#allocation7] sm:$0xff]  ;;  %v409_v4 = vld [vmem:[#allocation7 + $0x8] sm:$0xff] }
   0xe   :  { %v412_v5 = vsub.f32 1.0, %v407_v3  ;;  %v78_v6 = vmul.f32 0.25, %v407_v3  ;;  %v416_v7 = vsub.f32 1.0, %v409_v4  ;;  %v79_v8 = vmul.f32 0.25, %v409_v4  ;;  %88 = sbr.rel (%p265_p0) target bundleno = 64 (0x40), region = 25 }
  0x10   :  { %v80_v9 = vmul.f32 0.75, %v412_v5  ;;  %v81_v10 = vmul.f32 0.75, %v416_v7 }
  0x12   :  { %v421_v11 = vadd.f32 %v80_v9, %v78_v6  ;;  %v423_v12 = vadd.f32 %v81_v10, %v79_v8 }
  0x13   :  { %v89_v13 = vand.u32 2147483647, %v403_v1  ;;  %v90_v14 = vand.u32 2147483647, %v405_v2  ;;  %vm101_vm0 = vcmp.ge.f32.partialorder %v403_v1, 0.0  ;;  %vm102_vm1 = vcmp.ge.f32.partialorder %v405_v2, 0.0 }
  0x14   :  { %v107_v31 = vmax.f32 %v403_v1, 0.0  ;;  %v108_v36 = vmax.f32 %v405_v2, 0.0  ;;  %v109_v37 = vmul.f32 %v407_v3, %v403_v1  ;;  %v110_v40 = vmul.f32 %v409_v4, %v405_v2  ;;  %v173_v9 = vld [vmem:[#allocation9] sm:$0xff] }
  0x15   :  { %v91_v15 = vsub.f32 0.0, %v89_v13  ;;  %v92_v16 = vsub.f32 0.0, %v90_v14 }
  0x16   :  { %v111_v51 = vsub.f32 %v107_v31, %v109_v37  ;;  %v112_v53 = vsub.f32 %v108_v36, %v110_v40 }
  0x17   :  { %v93_v17 = vmul.f32 1.442695, %v91_v15  ;;  %v95_v18 = vmul.f32 1.442695, %v92_v16 }
  0x19   :  { %273 = vpow2.f32 %v93_v17 }
  0x1a   :  { %275 = vpow2.f32 %v95_v18 }
  0x1f   :  { %v274_v19 = vpop.eup %273 }
  0x20   :  { %v276_v20 = vpop.eup %275  ;;  %v97_v21 = vadd.f32 1.0, %v274_v19  ;;  %v116_v23 = vmul.f32 -0.5, %v274_v19  ;;  %v119_v32 = vand.u32 2147483647, %v274_v19 }
  0x21   :  { %v98_v22 = vadd.f32 1.0, %v276_v20  ;;  %v125_v24 = vmul.f32 -0.5, %v276_v20  ;;  %v128_v38 = vand.u32 2147483647, %v276_v20 }
  0x22   :  { %277 = vrcp.f32 %v97_v21  ;;  %v117_v28 = vadd.f32 1.0, %v116_v23  ;;  %vm120_vm2 = vcmp.lt.f32.partialorder %v119_v32, 0.0004427343 }
  0x23   :  { %279 = vrcp.f32 %v98_v22  ;;  %v126_v33 = vadd.f32 1.0, %v125_v24  ;;  %vm129_vm3 = vcmp.lt.f32.partialorder %v128_v38, 0.0004427343 }
  0x24   :  { %281 = vlog2.f32 %v97_v21  ;;  %v118_v44 = vmul.f32 %v274_v19, %v117_v28 }
  0x25   :  { %283 = vlog2.f32 %v98_v22  ;;  %v127_v48 = vmul.f32 %v276_v20, %v126_v33 }
  0x28   :  { %v278_v25 = vpop.eup %277 }
  0x29   :  { %v280_v26 = vpop.eup %279  ;;  %v103_v27 = vsub.f32 1.0, %v278_v25 }
  0x2a   :  { %v282_v29 = vpop.eup %281  ;;  %v104_v30 = vsub.f32 1.0, %v280_v26 }
  0x2b   :  { %v284_v34 = vpop.eup %283  ;;  %v105_v35 = vsel %vm101_vm0, %v278_v25, %v103_v27  ;;  %v115_v43 = vmul.f32 0.6931472, %v282_v29 }
  0x2c   :  { %v106_v39 = vsel %vm102_vm1, %v280_v26, %v104_v30  ;;  %v133_v41 = vmul.f32 %v105_v35, %v407_v3  ;;  %v135_v42 = vsub.f32 1.0, %v105_v35  ;;  %v124_v47 = vmul.f32 0.6931472, %v284_v34 }
  0x2d   :  { %v134_v45 = vmul.f32 %v106_v39, %v409_v4  ;;  %v136_v46 = vsub.f32 1.0, %v106_v39  ;;  %v121_v54 = vsel %vm120_vm2, %v118_v44, %v115_v43 }
  0x2e   :  { %v137_v49 = vmul.f32 %v135_v42, %v412_v5  ;;  %v130_v56 = vsel %vm129_vm3, %v127_v48, %v124_v47  ;;  %v131_v59 = vadd.f32 %v121_v54, %v111_v51 }
  0x2f   :  { %v138_v50 = vmul.f32 %v136_v46, %v416_v7  ;;  %v132_v61 = vadd.f32 %v130_v56, %v112_v53 }
  0x30   :  { %v139_v52 = vadd.f32 %v137_v49, %v133_v41 }
  0x31   :  { %v140_v55 = vadd.f32 %v138_v50, %v134_v45 }
  0x32   :  { %v141_v57 = vsub.f32 1.0, %v139_v52 }
  0x33   :  { %v142_v58 = vsub.f32 1.0, %v140_v55 }
  0x34   :  { %v143_v60 = vmul.f32 %v141_v57, %v141_v57 }
  0x35   :  { %v144_v62 = vmul.f32 %v142_v58, %v142_v58 }
  0x36   :  { %v145_v63 = vmul.f32 %v143_v60, %v421_v11 }
  0x37   :  { %v146_v0 = vmul.f32 %v144_v62, %v423_v12 }
  0x38   :  { %v147_v6 = vmul.f32 %v145_v63, %v131_v59 }
  0x39   :  { %v148_v8 = vmul.f32 %v146_v0, %v132_v61 }
  0x3b   :  { %v172_v10 = vadd.f32 %v148_v8, %v147_v6 }
  0x3d   :  { %v174_v13 = vadd.f32 %v173_v9, %v172_v10 }
  0x3f   :  { %175 = vst [vmem:[#allocation9] sm:$0xff] %v174_v13 }
  0x40 PF:  { %p266_p1 = scmp.ne.s32.totalorder %s462_s0, 0 }
  0x42   :  { %179 = sbr.rel (%p266_p1) target bundleno = 98 (0x62), region = 37 }
  0x47   :  { %v180_v14 = vmax.f32 %v403_v1, 1e-07  ;;  %v181_v15 = vmax.f32 %v405_v2, 1e-07  ;;  %v184_v2 = vsub.f32 0.0, %v407_v3  ;;  %v185_v26 = vsub.f32 0.0, %v409_v4 }
  0x48   :  { %v240_v46 = vld [vmem:[#allocation9] sm:$0xff] }
  0x49   :  { %v182_v16 = vmin.f32 %v180_v14, 0.9999999  ;;  %v183_v17 = vmin.f32 %v181_v15, 0.9999999 }
  0x4b   :  { %285 = vlog2.f32 %v182_v16  ;;  %v192_v18 = vsub.f32 1.0, %v182_v16  ;;  %v193_v19 = vsub.f32 1.0, %v183_v17  ;;  %v202_v20 = vmul.f32 %v182_v16, %v407_v3 }
  0x4c   :  { %287 = vlog2.f32 %v183_v17  ;;  %v203_v21 = vmul.f32 %v183_v17, %v409_v4 }
  0x4d   :  { %289 = vlog2.f32 %v192_v18  ;;  %v204_v22 = vmul.f32 %v192_v18, %v412_v5  ;;  %v205_v23 = vmul.f32 %v193_v19, %v416_v7 }
  0x4e   :  { %291 = vlog2.f32 %v193_v19 }
  0x4f   :  { %v206_v24 = vadd.f32 %v204_v22, %v202_v20  ;;  %v207_v1 = vadd.f32 %v205_v23, %v203_v21 }
  0x51   :  { %v286_v25 = vpop.eup %285  ;;  %v208_v27 = vsub.f32 1.0, %v206_v24  ;;  %v209_v28 = vsub.f32 1.0, %v207_v1 }
  0x52   :  { %v288_v29 = vpop.eup %287  ;;  %v187_v30 = vmul.f32 0.6931472, %v286_v25 }
  0x53   :  { %v290_v31 = vpop.eup %289  ;;  %v189_v32 = vmul.f32 0.6931472, %v288_v29  ;;  %v210_v33 = vmul.f32 %v208_v27, %v208_v27  ;;  %v211_v34 = vmul.f32 %v209_v28, %v209_v28 }
  0x54   :  { %v292_v35 = vpop.eup %291  ;;  %v190_v36 = vmul.f32 %v187_v30, %v184_v2  ;;  %v195_v37 = vmul.f32 0.6931472, %v290_v31 }
  0x55   :  { %v191_v38 = vmul.f32 %v189_v32, %v185_v26  ;;  %v197_v39 = vmul.f32 0.6931472, %v292_v35  ;;  %v212_v3 = vmul.f32 %v210_v33, %v421_v11  ;;  %v213_v4 = vmul.f32 %v211_v34, %v423_v12 }
  0x56   :  { %v198_v40 = vmul.f32 %v195_v37, %v412_v5 }
  0x57   :  { %v199_v41 = vmul.f32 %v197_v39, %v416_v7 }
  0x58   :  { %v200_v42 = vsub.f32 %v190_v36, %v198_v40 }
  0x59   :  { %v201_v43 = vsub.f32 %v191_v38, %v199_v41 }
  0x5a   :  { %v214_v44 = vmul.f32 %v212_v3, %v200_v42 }
  0x5b   :  { %v215_v45 = vmul.f32 %v213_v4, %v201_v43 }
  0x5d   :  { %v239_v47 = vadd.f32 %v215_v45, %v214_v44 }
  0x5f   :  { %v241_v48 = vadd.f32 %v240_v46, %v239_v47 }
  0x61   :  { %242 = vst [vmem:[#allocation9] sm:$0xff] %v241_v48 }
  0x62 PF:  { %s250_s27 = sshll.u32 %s465_s3, 4  ;;  %s376_s28 = smov [#allocation9]   ;;  %s251_s27 = int_to_ptr.hbm [resolvable:$true] %s250_s27 }
  0x63   :  { %s248_s29 = sshll.u32 %s376_s28, 4  ;;  %s249_s29 = int_to_ptr.vmem [resolvable:$true] %s248_s29 }
  0x64   :  { %253 = dma.vmem_to_hbm [thread:$0]  %s249_s29, 128, %s251_s27, [#allocation6]  }
  0x65   :  { %369 = dma.done.wait [#allocation6], 128  }
  0x66   :  { %370 = vsyncadd [#allocation6], 4294967168 }
  0x67   :  { %258 = vsyncpa [#allocation5], 1 }
  0x68   :  { %259 = vsyncpa [#allocation8], 1 }
  0x69   :  { %260 = vsyncpa [#allocation6], 1 }

</bundles_post_ra>
